<compile_context>
chip_gen: v6e
topology: v6e:2x2x1
jax: 0.10.0
libtpu: 0.0.40
codegen_flags: <defaults>
</compile_context>

<pallas_src>
import functools

import jax
import jax.numpy as jnp
from jax.experimental import pallas as pl
from jax.experimental.pallas import tpu as pltpu


def _squasher_kernel(x_ref, o_ref, *, mean_scale, ls_scale, ls_bias):
    # Stream 0 = mean path:     out = mean_scale * tanh(x) + 0
    # Stream 1 = log_std path:  out = ls_scale   * tanh(x) + ls_bias
    s = pl.program_id(0)
    scale = jnp.where(s == 0, mean_scale, ls_scale)
    bias = jnp.where(s == 0, 0.0, ls_bias)
    t = jnp.tanh(x_ref[...].astype(jnp.float32))   # EUP tanh in f32
    o_ref[...] = (scale * t + bias).astype(o_ref.dtype)


def tanh_normal_squasher(mean, log_std, scaler=1.0,
                         min_log_std=-20.0, max_log_std=2.0,
                         tile_rows=512):
    assert mean.shape == log_std.shape
    assert mean.dtype == log_std.dtype
    orig_shape = mean.shape
    dtype = mean.dtype
    n = mean.size

    # ---- lane-dense slab layout: flatten -> pad -> (R, 128), stacked x2 ----
    rows = -(-n // 128)                       # ceil(n / 128)
    rows8 = -(-rows // 8) * 8                 # round up to sublane multiple
    t = max(8, (min(tile_rows, rows8) // 8) * 8)
    R = -(-rows8 // t) * t                    # rows rounded up to tile multiple

    def to_slab(x):
        flat = x.reshape(-1)
        pad = R * 128 - n
        if pad:
            flat = jnp.pad(flat, (0, pad))
        return flat.reshape(R, 128)

    slab = jnp.stack([to_slab(mean), to_slab(log_std)], axis=0)  # (2, R, 128)

    # ---- constant-fold the affine transforms -------------------------------
    half_range = 0.5 * (float(max_log_std) - float(min_log_std))
    kernel = functools.partial(
        _squasher_kernel,
        mean_scale=float(scaler),
        ls_scale=half_range,
        ls_bias=float(min_log_std) + half_range,
    )

    spec = pl.BlockSpec((None, t, 128), lambda s, i: (s, i, 0))

    out = pl.pallas_call(
        kernel,
        out_shape=jax.ShapeDtypeStruct((2, R, 128), dtype),
        grid_spec=pltpu.PrefetchScalarGridSpec(
            num_scalar_prefetch=0,
            grid=(2, R // t),
            in_specs=[spec],
            out_specs=spec,
        ),
        compiler_params=pltpu.CompilerParams(
            dimension_semantics=("parallel", "parallel"),
            vmem_limit_bytes=32 * 1024 * 1024,
        ),
    )(slab)

    mean_out = out[0].reshape(-1)[:n].reshape(orig_shape)
    log_std_out = out[1].reshape(-1)[:n].reshape(orig_shape)
    return mean_out, log_std_out


if __name__ == "__main__":
    key = jax.random.PRNGKey(0)
    k_mean, k_logstd = jax.random.split(key)

    # Small shapes consistent with a policy head: batch=8, action_dim=32.
    B, D = 8, 32
    mean_in = jax.random.normal(k_mean, (B, D), dtype=jnp.float32) * 3.0
    log_std_in = jax.random.normal(k_logstd, (B, D), dtype=jnp.float32) * 2.0

    scaler = 1.0
    min_log_std = -20.0
    max_log_std = 2.0

    mean_out, log_std_out = tanh_normal_squasher(
        mean_in, log_std_in, scaler, min_log_std, max_log_std)
    mean_out = jax.block_until_ready(mean_out)
    log_std_out = jax.block_until_ready(log_std_out)

    # Reference check against pure-JAX implementation of the PyTorch forward.
    ref_log_std = min_log_std + (max_log_std - min_log_std) * 0.5 * (
        1.0 + jnp.tanh(log_std_in))
    ref_mean = scaler * jnp.tanh(mean_in)

    assert jnp.allclose(mean_out, ref_mean, atol=1e-5, rtol=1e-5)
    assert jnp.allclose(log_std_out, ref_log_std, atol=1e-5, rtol=1e-5)

    print("KERNEL_OK")
</pallas_src>

<mosaic_0001>
module attributes {stable_mosaic.version = 11 : i64} {
  func.func @_squasher_kernel(%arg0: i32, %arg1: i32, %arg2: memref<1x8x128xf32, #tpu.memory_space<vmem>>, %arg3: memref<1x8x128xf32, #tpu.memory_space<vmem>>) attributes {dimension_semantics = [#tpu.dimension_semantics<parallel>, #tpu.dimension_semantics<parallel>], iteration_bounds = array<i64: 2, 1>, scalar_prefetch = 0 : i64, scratch_operands = 0 : i64, tpu.core_type = #tpu.core_type<tc>, window_params = [{transform_indices = @transform_0, window_bounds = array<i64: 1, 8, 128>}, {transform_indices = @transform_1, window_bounds = array<i64: 1, 8, 128>}]} {
    %c0_i32 = arith.constant 0 : i32
    %0 = arith.cmpi eq, %arg0, %c0_i32 : i32
    %cst = arith.constant 1.000000e+00 : f32
    %cst_0 = arith.constant 1.100000e+01 : f32
    %1 = arith.select %0, %cst, %cst_0 : f32
    %c0_i32_1 = arith.constant 0 : i32
    %2 = arith.cmpi eq, %arg0, %c0_i32_1 : i32
    %cst_2 = arith.constant 0.000000e+00 : f32
    %cst_3 = arith.constant -9.000000e+00 : f32
    %3 = arith.select %2, %cst_2, %cst_3 : f32
    %c0 = arith.constant 0 : index
    %c0_4 = arith.constant 0 : index
    %c0_5 = arith.constant 0 : index
    %4 = vector.load %arg2[%c0, %c0_4, %c0_5] : memref<1x8x128xf32, #tpu.memory_space<vmem>>, vector<1x8x128xf32>
    %5 = vector.shape_cast %4 : vector<1x8x128xf32> to vector<8x128xf32>
    %6 = math.tanh %5 : vector<8x128xf32>
    %7 = vector.broadcast %1 : f32 to vector<8x128xf32>
    %8 = arith.mulf %7, %6 : vector<8x128xf32>
    %9 = vector.broadcast %3 : f32 to vector<8x128xf32>
    %10 = arith.addf %8, %9 : vector<8x128xf32>
    %c0_6 = arith.constant 0 : index
    %c0_7 = arith.constant 0 : index
    %c0_8 = arith.constant 0 : index
    %11 = vector.load %arg3[%c0_6, %c0_7, %c0_8] : memref<1x8x128xf32, #tpu.memory_space<vmem>>, vector<1x8x128xf32>
    %12 = vector.shape_cast %11 : vector<1x8x128xf32> to vector<8x128xf32>
    %13 = vector.shape_cast %10 : vector<8x128xf32> to vector<1x8x128xf32>
    tpu.vector_store %arg3[%c0_6, %c0_7, %c0_8], %13 {strides = array<i32>} : memref<1x8x128xf32, #tpu.memory_space<vmem>>, vector<1x8x128xf32>,
    return
  }
  func.func @transform_0(%arg0: i32, %arg1: i32) -> (i32, i32, i32) {
    %c0_i32 = arith.constant 0 : i32
    %c0_i32_0 = arith.constant 0 : i32
    return %arg0, %arg1, %c0_i32 : i32, i32, i32
  }
  func.func @transform_1(%arg0: i32, %arg1: i32) -> (i32, i32, i32) {
    %c0_i32 = arith.constant 0 : i32
    %c0_i32_0 = arith.constant 0 : i32
    return %arg0, %arg1, %c0_i32 : i32, i32, i32
  }
}

</mosaic_0001>

<bundles_post_ra>
// kernel: tpu_custom_call.1
= control target key start
LH: loop header
LB: loop body
LE: loop exit
PB: predicated region body
PF: predicated region fallthrough
CT: control target
= control target key end

     0   :  { %6 = vsyncpa [#allocation3], 0  ;;  %s588_s0 = inlined_call_operand.hbm [shape: f32[2,8,128], index: 0, kind: input, shape index: {}]   ;;  %s589_s1 = inlined_call_operand.hbm [shape: f32[2,8,128], index: 1, kind: output, shape index: {}]  }
   0x1   :  { %8 = vsyncpa [#allocation3 + $0x1], 0 }
   0x2   :  { %9 = vsyncpa [#allocation4], 0 }
   0x3   :  { %11 = vsyncpa [#allocation4 + $0x1], 0  ;;  %s453_s6 = smov 0   ;;  %s455_s7 = smov 0  }
   0x4   :  { %s457_s8 = smov 0   ;;  %s459_s9 = smov 0  }
   0x5   :  { %s461_s10 = smov 0   ;;  %s463_s11 = smov 0  }
   0x6 LB: > { %s254_s12 = sadd.s32 4294967295, %s439_s11   ;;  %s255_s13 = sadd.s32 4294967294, %s439_s11   ;;  %s439_s11 = sphi %s463_s11, %s17_s11   ;;  %s435_s10 = sphi %s461_s10, %s601_s10   ;;  %s431_s9 = sphi %s459_s9, %s600_s9   ;;  %s427_s8 = sphi %s457_s8, %s599_s8   ;;  %s423_s7 = sphi %s455_s7, %s598_s7   ;;  %s419_s6 = sphi %s453_s6, %s597_s6  }
   0x7   : > { %s29_s14 = sadd.s32 1, %s435_s10  ;;  %s38_s15 = sadd.s32 1, %s427_s8 }
   0x8   : > { %p31_p0 = scmp.ge.s32.totalorder %s29_s14, 2  ;;  %p45_p1 = scmp.ne.s32.totalorder %s427_s8, %s423_s7 }
   0x9   : > { %p46_p2 = scmp.eq.s32.totalorder %s439_s11, 0  ;;  %p51_p3 = scmp.ne.s32.totalorder %s423_s7, %s419_s6 }
   0xa   : > { %s603_s14 = smov (%p31_p0, %s29_s14), 0  ;;  %p52_p5 = scmp.eq.s32.totalorder %s254_s12, 0 }
   0xb   : > { %p494_p4 = por %p46_p2, %p45_p1  ;;  %s33_s17 = ssub.s32 %s435_s10, %s603_s14 }
   0xc   : > { %p77_p6 = scmp.eq.s32.totalorder %s254_s12, 1  ;;  %p36_p7 = scmp.eq.s32.totalorder %s33_s17, 0 }
   0xd   : > { %p500_p8 = por %p52_p5, %p51_p3  ;;  %p83_p10 = scmp.eq.s32.totalorder %s255_s13, 1 }
   0xe   : > { %p504_p9 = por %p77_p6, %p45_p1  ;;  %p279_p13 = scmp.lt.s32.totalorder %s439_s11, 2 }
   0xf   : > { %s509_s20 = scalar_select %p36_p7, %s427_s8, %s38_s15  }
  0x10   : > { %p511_p11 = por %p83_p10, %p51_p3  ;;  %s103_s22 = sand.u32 1, %s427_s8  }
  0x11   : > { %s258_s23 = sshll.u32 %s103_s22, 3  ;;  %s259_s24 = sshll.u32 %s435_s10, 7 }
  0x12   : > { %s593_s21 = scalar_select %p511_p11, 1, 0 }
  0x13   : > { %s113_s27 = scalar_lea.hbm %s588_s0, %s259_s24  ;;  %s107_s28 = scalar_lea.vmem [#allocation2], %s258_s23 }
  0x14   : > { %s115_s29 = sshll.u32 %s107_s28, 4  ;;  %p524_p0 = pnand %p279_p13, %p494_p4  ;;  %s116_s29 = int_to_ptr.vmem [resolvable:$true] %s115_s29 }
  0x15   : > { %p260_p1 = scmp.ge.s32.totalorder %s439_s11, 1  ;;  %p120_p2 = scmp.lt.s32.totalorder %s439_s11, 3 }
  0x16   : > { %s104_s2 = scalar_lea.sflag [#allocation3], %s103_s22  ;;  %p333_p3 = pneg %p524_p0 }
  0x17   : > { %s344_s3 = scalar_lea.vmem %s116_s29, 128  ;;  %s441_s4 = smov [#allocation2]  }
  0x18   : > { %p345_p5 = scmp.ne.s32.totalorder %s116_s29, %s344_s3  ;;  %s349_s5 = sshll.u32 %s441_s4, 4  ;;  %s350_s5 = int_to_ptr.vmem [resolvable:$false] %s349_s5 }
  0x19   : > { %s351_s12 = scalar_lea.vmem %s350_s5, 256  ;;  %p352_p10 = scmp.lt.s32.totalorder %s116_s29, %s350_s5 }
  0x1a   : > { %p347_p6 = pnand %p345_p5, %p333_p3  ;;  %p353_p12 = scmp.lt.s32.totalorder %s351_s12, %s344_s3 }
  0x1c   : > { %p348_p7 = pneg %p347_p6  ;;  %p354_p4 = por %p353_p12, %p352_p10 }
  0x1e   : > { %p355_p13 = pnand %p354_p4, %p348_p7 }
  0x20   : > { %358 = shalt.err (!%p355_p13)
}
  0x21   : > { %274 = dma.hbm_to_vmem [thread:$0]  (!%p524_p0), %s113_s27, 128, %s116_s29, %s104_s2  }
  0x22   : > { %p121_p11 = pnand %p260_p1, %p120_p2 }
  0x23   : > { %s539_s13 = sand.u32 (!%p121_p11), 1, %s423_s7  }
  0x24   : > { %124 = sbr.rel (%p121_p11) target bundleno = 74 (0x4a), region = 24  ;;  %s261_s15 = sshll.u32 (!%p121_p11), %s539_s13, 3 }
  0x25   : > { %s127_s16 = scalar_lea.sflag (!%p121_p11), [#allocation3], %s539_s13  ;;  %s130_s17 = scalar_lea.vmem (!%p121_p11), [#allocation2], %s261_s15 }
  0x29   : > { %410 = dma.done.wait (%p500_p8), %s127_s16, 128  }
  0x2a   : > { %412 = vsyncadd (%p500_p8), %s127_s16, 4294967168  ;;  %v152_v0 = vld [vmem:[%s130_s17] sm:$0xff]  ;;  %p149_p11 = scmp.eq.s32.totalorder %s431_s9, 0  ;;  %s148_s24 = scalar_lea.vmem [#allocation5], %s261_s15 }
  0x2b   : > { %329 = vtanh.f32 %v152_v0  ;;  %s174_s25 = sshll.u32 %s148_s24, 4  ;;  %s264_s26 = sshll.u32 %s431_s9, 7  ;;  %s175_s25 = int_to_ptr.vmem [resolvable:$true] %s174_s25 }
  0x2c   : > { %s150_s22 = scalar_select %p149_p11, 1.0, 11.0 }
  0x2d   : > { %s151_s23 = scalar_select %p149_p11, 0.0, -9.0 }
  0x2e   : > { %v154_v1 = vstv %s150_s22  ;;  %s172_s28 = scalar_lea.hbm %s589_s1, %s264_s26  ;;  %s160_s29 = scalar_lea.sflag [#allocation4], %s539_s13 }
  0x2f   : > { %v156_v3 = vstv %s151_s23  ;;  %s359_s30 = scalar_lea.vmem %s175_s25, 128  ;;  %s442_s2 = smov [#allocation5]  }
  0x30   : > { %p360_p8 = scmp.ne.s32.totalorder %s175_s25, %s359_s30  ;;  %s363_s3 = sshll.u32 %s442_s2, 4  ;;  %s364_s3 = int_to_ptr.vmem [resolvable:$false] %s363_s3 }
  0x31   : > { %s365_s4 = scalar_lea.vmem %s364_s3, 256  ;;  %p366_p1 = scmp.lt.s32.totalorder %s175_s25, %s364_s3 }
  0x32   : > { %p361_p12 = pnand %p360_p8, %p504_p9  ;;  %p367_p2 = scmp.lt.s32.totalorder %s365_s4, %s359_s30 }
  0x34   : > { %p362_p0 = pneg %p361_p12  ;;  %p368_p3 = por %p367_p2, %p366_p1 }
  0x36   : > { %p369_p5 = pnand %p368_p3, %p362_p0 }
  0x38   : > { %v330_v2 = vpop.eup %329 }
  0x39   : > { %v155_v4 = vmul.f32 %v330_v2, %v154_v1 }
  0x3b   : > { %v157_v5 = vadd.f32 %v156_v3, %v155_v4 }
  0x3d   : > { %158 = vst [vmem:[%s148_s24] sm:$0xff] %v157_v5 }
  0x3e   : > { %372 = shalt.err (!%p369_p5)
}
  0x3f   : > { %s373_s9 = scalar_lea.hbm %s172_s28, 128  ;;  %s377_s13 = scalar_lea.hbm %s589_s1, 256 }
  0x40   : > { %p374_p6 = scmp.ne.s32.totalorder %s172_s28, %s373_s9  ;;  %p378_p4 = scmp.lt.s32.totalorder %s172_s28, %s589_s1 }
  0x41   : > { %p379_p13 = scmp.lt.s32.totalorder %s377_s13, %s373_s9 }
  0x42   : > { %p375_p7 = pnand %p374_p6, %p504_p9 }
  0x43   : > { %p380_p11 = por %p379_p13, %p378_p4 }
  0x44   : > { %p376_p10 = pneg %p375_p7 }
  0x46   : > { %p381_p8 = pnand %p380_p11, %p376_p10 }
  0x48   : > { %384 = shalt.err (!%p381_p8)
}
  0x49   : > { %269 = dma.vmem_to_hbm [thread:$0]  (%p504_p9), %s175_s25, 128, %s172_s28, %s160_s29  }
  0x4a PF: > { %s186_s17 = sand.u32 1, %s419_s6   ;;  %p595_p12 = scmp.ne.s32.totalorder %s593_s21, 0 }
  0x4b   : > { %p596_p0 = scmp.ge.s32.totalorder %s439_s11, 2  ;;  %s187_s22 = scalar_lea.sflag [#allocation4], %s186_s17 }
  0x4d   : > { %p276_p1 = pnand %p596_p0, %p595_p12 }
  0x4f   : > { %p277_p2 = pneg %p276_p1 }
  0x51   : > { %414 = dma.done.wait (%p277_p2), %s187_s22, 128  }
  0x52   : > { %416 = vsyncadd (%p277_p2), %s187_s22, 4294967168  ;;  %s17_s11 = sadd.s32 1, %s439_s11   ;;  %s597_s6 = smov %s423_s7 }
  0x53   : > { %p14_p3 = scmp.ge.s32.totalorder %s17_s11, 4   ;;  %s598_s7 = smov %s427_s8 }
  0x54   : > { %s599_s8 = smov %s509_s20  ;;  %s600_s9 = smov %s435_s10 }
  0x55   : > { %s601_s10 = smov %s603_s14  ;;  %16 = sbr.rel (!%p14_p3) target bundleno = 6 (0x6), region = 69 }
  0x5a   :  { %192 = vsyncpa [#allocation3], 1 }
  0x5b   :  { %194 = vsyncpa [#allocation3 + $0x1], 1 }
  0x5c   :  { %195 = vsyncpa [#allocation4], 1 }
  0x5d   :  { %197 = vsyncpa [#allocation4 + $0x1], 1 }

</bundles_post_ra>
